<compile_context>
chip_gen: v7x
topology: tpu7x:2x2x1
jax: 0.10.0
libtpu: 0.0.40
codegen_flags: <defaults>
</compile_context>

<pallas_src>
import jax
import jax.numpy as jnp
from jax.experimental import pallas as pl
from jax.experimental.pallas import tpu as pltpu

LANE = 128
MAX_TILE_ROWS = 2048  # (2048, 128) f32 = 1 MiB per input block per grid step


def _sq_err_sum_kernel(x_ref, t_ref, out_ref, acc_ref):
    # acc_ref: VMEM (tile_rows, 128) f32 accumulator, resident across the grid.
    # out_ref: SMEM (1,) f32 scalar output, written once at the last step.
    @pl.when(pl.program_id(0) == 0)
    def _():
        acc_ref[...] = jnp.zeros_like(acc_ref)

    d = x_ref[...].astype(jnp.float32) - t_ref[...].astype(jnp.float32)
    acc_ref[...] += d * d  # pure VPU elementwise; no per-step XLU reduce

    @pl.when(pl.program_id(0) == pl.num_programs(0) - 1)
    def _():
        out_ref[0] = jnp.sum(acc_ref[...])  # single XLU reduction at the end


def _round_up(a, m):
    return ((a + m - 1) // m) * m


def rmse(inputs, target):
    n = inputs.size
    assert n == target.size, "input and target must have the same number of elements"

    # Flatten (no dtype cast in the wrapper; cast happens inside the kernel).
    x = inputs.reshape(-1)
    t = target.reshape(-1)

    # Choose the largest lane-dense tile up to MAX_TILE_ROWS rows.
    rows = -(-n // LANE)                       # ceil(n / 128)
    tile_rows = min(MAX_TILE_ROWS, _round_up(max(rows, 1), 8))
    padded_rows = _round_up(rows, tile_rows)
    pad_elems = padded_rows * LANE - n

    # Zero-pad BOTH operands -> padded diffs are exactly zero, no mask needed.
    if pad_elems:
        x = jnp.pad(x, (0, pad_elems))
        t = jnp.pad(t, (0, pad_elems))
    x2d = x.reshape(padded_rows, LANE)
    t2d = t.reshape(padded_rows, LANE)

    num_tiles = padded_rows // tile_rows

    sq_sum = pl.pallas_call(
        _sq_err_sum_kernel,
        out_shape=jax.ShapeDtypeStruct((1,), jnp.float32),
        grid=(num_tiles,),
        in_specs=[
            pl.BlockSpec((tile_rows, LANE), lambda i: (i, 0)),
            pl.BlockSpec((tile_rows, LANE), lambda i: (i, 0)),
        ],
        out_specs=pl.BlockSpec(memory_space=pltpu.SMEM),
        scratch_shapes=[pltpu.VMEM((tile_rows, LANE), jnp.float32)],
        compiler_params=pltpu.CompilerParams(
            dimension_semantics=("arbitrary",),
        ),
    )(x2d, t2d)

    return jnp.sqrt(sq_sum[0] / jnp.float32(n))


if __name__ == "__main__":
    key = jax.random.PRNGKey(0)
    kx, kt = jax.random.split(key)
    # Shapes consistent with a regression metric over NCHW-style activations.
    x = jax.random.normal(kx, (2, 4, 16, 16), dtype=jnp.float32)
    t = jax.random.normal(kt, (2, 4, 16, 16), dtype=jnp.float32)

    out = jax.block_until_ready(rmse(x, t))

    # Reference check (pure JAX, same math as the PyTorch module).
    ref = jnp.sqrt(jnp.mean((x - t) ** 2))
    assert jnp.allclose(out, ref, rtol=1e-5, atol=1e-5), (out, ref)

    print("KERNEL_OK")
</pallas_src>

<mosaic_0001>
module attributes {stable_mosaic.version = 11 : i64} {
  func.func @_sq_err_sum_kernel(%arg0: i32, %arg1: memref<16x128xf32, #tpu.memory_space<vmem>>, %arg2: memref<16x128xf32, #tpu.memory_space<vmem>>, %arg3: memref<1xf32, #tpu.memory_space<smem>>, %arg4: memref<16x128xf32, #tpu.memory_space<vmem>>) attributes {dimension_semantics = [#tpu.dimension_semantics<arbitrary>], iteration_bounds = array<i64: 1>, scalar_prefetch = 0 : i64, scratch_operands = 1 : i64, tpu.core_type = #tpu.core_type<tc>, window_params = [{transform_indices = @transform_0, window_bounds = array<i64: 16, 128>}, {transform_indices = @transform_1, window_bounds = array<i64: 16, 128>}, {transform_indices = @transform_2, window_bounds = array<i64: 1>}]} {
    %c0_i32 = arith.constant 0 : i32
    %0 = arith.cmpi eq, %arg0, %c0_i32 : i32
    %1 = arith.extui %0 : i1 to i32
    %c0_i32_0 = arith.constant 0 : i32
    %2 = arith.cmpi ne, %1, %c0_i32_0 : i32
    scf.if %2 {
      %cst = arith.constant 0.000000e+00 : f32
      %13 = vector.broadcast %cst : f32 to vector<16x128xf32>
      %c0_10 = arith.constant 0 : index
      %c0_11 = arith.constant 0 : index
      %14 = vector.load %arg4[%c0_10, %c0_11] : memref<16x128xf32, #tpu.memory_space<vmem>>, vector<16x128xf32>
      tpu.vector_store %arg4[%c0_10, %c0_11], %13 {strides = array<i32>} : memref<16x128xf32, #tpu.memory_space<vmem>>, vector<16x128xf32>,
    } else {
    }
    %c0 = arith.constant 0 : index
    %c0_1 = arith.constant 0 : index
    %3 = vector.load %arg1[%c0, %c0_1] : memref<16x128xf32, #tpu.memory_space<vmem>>, vector<16x128xf32>
    %c0_2 = arith.constant 0 : index
    %c0_3 = arith.constant 0 : index
    %4 = vector.load %arg2[%c0_2, %c0_3] : memref<16x128xf32, #tpu.memory_space<vmem>>, vector<16x128xf32>
    %5 = arith.subf %3, %4 : vector<16x128xf32>
    %c0_4 = arith.constant 0 : index
    %c0_5 = arith.constant 0 : index
    %6 = vector.load %arg4[%c0_4, %c0_5] : memref<16x128xf32, #tpu.memory_space<vmem>>, vector<16x128xf32>
    %7 = arith.mulf %5, %5 : vector<16x128xf32>
    %8 = arith.addf %6, %7 : vector<16x128xf32>
    %c0_6 = arith.constant 0 : index
    %c0_7 = arith.constant 0 : index
    %9 = vector.load %arg4[%c0_6, %c0_7] : memref<16x128xf32, #tpu.memory_space<vmem>>, vector<16x128xf32>
    tpu.vector_store %arg4[%c0_6, %c0_7], %8 {strides = array<i32>} : memref<16x128xf32, #tpu.memory_space<vmem>>, vector<16x128xf32>,
    %c0_i32_8 = arith.constant 0 : i32
    %10 = arith.cmpi eq, %arg0, %c0_i32_8 : i32
    %11 = arith.extui %10 : i1 to i32
    %c0_i32_9 = arith.constant 0 : i32
    %12 = arith.cmpi ne, %11, %c0_i32_9 : i32
    scf.if %12 {
      %c0_10 = arith.constant 0 : index
      %c0_11 = arith.constant 0 : index
      %13 = vector.load %arg4[%c0_10, %c0_11] : memref<16x128xf32, #tpu.memory_space<vmem>>, vector<16x128xf32>
      %14 = vector.shape_cast %13 : vector<16x128xf32> to vector<1x16x128xf32>
      %cst = arith.constant dense<0.000000e+00> : vector<1xf32>
      %15 = vector.multi_reduction <add>, %14, %cst [1, 2] : vector<1x16x128xf32> to vector<1xf32>
      %16 = vector.shape_cast %15 : vector<1xf32> to vector<1x1x1xf32>
      %17 = vector.extract %16[0, 0, 0] : f32 from vector<1x1x1xf32>
      %c0_12 = arith.constant 0 : index
      %18 = memref.load %arg3[%c0_12] : memref<1xf32, #tpu.memory_space<smem>>
      memref.store %17, %arg3[%c0_12] : memref<1xf32, #tpu.memory_space<smem>>
    } else {
    }
    return
  }
  func.func @transform_0(%arg0: i32) -> (i32, i32) {
    %c0_i32 = arith.constant 0 : i32
    %c0_i32_0 = arith.constant 0 : i32
    return %arg0, %c0_i32 : i32, i32
  }
  func.func @transform_1(%arg0: i32) -> (i32, i32) {
    %c0_i32 = arith.constant 0 : i32
    %c0_i32_0 = arith.constant 0 : i32
    return %arg0, %c0_i32 : i32, i32
  }
  func.func @transform_2(%arg0: i32) -> i32 {
    %c0_i32 = arith.constant 0 : i32
    %c0_i32_0 = arith.constant 0 : i32
    return %c0_i32 : i32
  }
}

</mosaic_0001>

<bundles_post_ra>
// kernel: tpu_custom_call.1
= control target key start
LH: loop header
LB: loop body
LE: loop exit
PB: predicated region body
PF: predicated region fallthrough
CT: control target
= control target key end

     0   :  { %7 = vsyncpa [#allocation4], 0  ;;  %s215_s0 = inlined_call_operand.hbm [shape: f32[16,128], index: 0, kind: input, shape index: {}]   ;;  %s216_s1 = inlined_call_operand.hbm [shape: f32[16,128], index: 1, kind: input, shape index: {}]   ;;  %s217_s2 = inlined_call_operand.hbm [shape: f32[1], index: 2, kind: output, shape index: {}]  }
   0x1   :  { %8 = vsyncpa [#allocation7], 0 }
   0x2   :  { %9 = vsyncpa [#allocation5], 0  ;;  %s159_s9 = smov [#allocation3]   ;;  %s99_s13 = scalar_lea.hbm %s215_s0, 256 }
   0x3   :  { %s15_s10 = sshll.u32 %s159_s9, 4  ;;  %p100_p0 = scmp.ne.s32.totalorder %s215_s0, %s99_s13  ;;  %s16_s10 = int_to_ptr.vmem [resolvable:$true] %s15_s10 }
   0x4   :  { %p103_p1 = scmp.lt.u32.totalorder %s99_s13, %s215_s0 }
   0x6   :  { %p105_p2 = pnand %p103_p1, %p100_p0 }
   0x8   :  { %108 = shalt.err (!%p105_p2)
}
   0x9   :  { %s109_s18 = scalar_lea.vmem %s16_s10, 256  ;;  %p114_p4 = scmp.lt.s32.totalorder %s16_s10, %s16_s10 }
   0xa   :  { %p110_p3 = scmp.ne.s32.totalorder %s16_s10, %s109_s18  ;;  %p115_p5 = scmp.lt.s32.totalorder %s109_s18, %s109_s18 }
   0xc   :  { %p116_p6 = por %p115_p5, %p114_p4 }
   0xe   :  { %p117_p7 = pnand %p116_p6, %p110_p3 }
  0x10   :  { %120 = shalt.err (!%p117_p7)
}
  0x11   :  { %s160_s19 = smov 128   ;;  %s161_s20 = smov 8  }
  0x12   :  { %21 = dma.hbm_to_vmem [thread:$0]  %s215_s0, 256, %s16_s10, [#allocation4], %s160_s19, %s160_s19, %s161_s20  }
  0x13   :  { %s162_s23 = smov [#allocation6]   ;;  %s121_s27 = scalar_lea.hbm %s216_s1, 256 }
  0x14   :  { %s27_s24 = sshll.u32 %s162_s23, 4  ;;  %p122_p8 = scmp.ne.s32.totalorder %s216_s1, %s121_s27  ;;  %s28_s24 = int_to_ptr.vmem [resolvable:$true] %s27_s24 }
  0x15   :  { %p125_p9 = scmp.lt.u32.totalorder %s121_s27, %s216_s1 }
  0x17   :  { %p127_p10 = pnand %p125_p9, %p122_p8 }
  0x19   :  { %130 = shalt.err (!%p127_p10)
}
  0x1a   :  { %s131_s4 = scalar_lea.vmem %s28_s24, 256  ;;  %p136_p12 = scmp.lt.s32.totalorder %s28_s24, %s28_s24 }
  0x1b   :  { %p132_p11 = scmp.ne.s32.totalorder %s28_s24, %s131_s4  ;;  %p137_p13 = scmp.lt.s32.totalorder %s131_s4, %s131_s4 }
  0x1d   :  { %p138_p0 = por %p137_p13, %p136_p12 }
  0x1f   :  { %p139_p1 = pnand %p138_p0, %p132_p11 }
  0x21   :  { %142 = shalt.err (!%p139_p1)
}
  0x22   :  { %33 = dma.hbm_to_vmem [thread:$0]  %s216_s1, 256, %s28_s24, [#allocation7], %s160_s19, %s160_s19, %s161_s20  }
  0x23   :  { %153 = dma.done.wait [#allocation4], 256  }
  0x24   :  { %154 = vsyncadd [#allocation4], 4294967040 }
  0x25   :  { %155 = dma.done.wait [#allocation7], 256  }
  0x26   :  { %156 = vsyncadd [#allocation7], 4294967040  ;;  %v46_v0 = vld [vmem:[#allocation3] sm:$0xff]  ;;  %v47_v1 = vld [vmem:[#allocation3 + $0x8] sm:$0xff]  ;;  %s143_s8 = scalar_lea.hbm %s217_s2, 16 }
  0x27   :  { %v48_v2 = vld [vmem:[#allocation6] sm:$0xff]  ;;  %v49_v3 = vld [vmem:[#allocation6 + $0x8] sm:$0xff]  ;;  %p144_p2 = scmp.ne.s32.totalorder %s217_s2, %s143_s8  ;;  %p147_p3 = scmp.lt.u32.totalorder %s143_s8, %s217_s2 }
  0x28   :  { %v50_v4 = vsub.f32 %v46_v0, %v48_v2  ;;  %v51_v5 = vsub.f32 %v47_v1, %v49_v3 }
  0x29   :  { %p149_p4 = pnand %p147_p3, %p144_p2 }
  0x2a   :  { %v54_v6 = vmul.f32 %v50_v4, %v50_v4  ;;  %v55_v7 = vmul.f32 %v51_v5, %v51_v5 }
  0x2c   :  { %v65_v8 = vadd.f32 %v55_v7, %v54_v6 }
  0x2e   :  { %66 = vadd.xlane.f32.xlu0 %v65_v8 }
  0xbb   :  { %v67_v9 = vpop.xlane.xlu0 %66 }
  0xbc   :  { %v68_v10 = vrot.slane %v67_v9, 4 }
  0xbe   :  { %v69_v11 = vadd.f32 %v68_v10, %v67_v9 }
  0xc0   :  { %v70_v12 = vrot.slane %v69_v11, 2 }
  0xc2   :  { %v71_v13 = vadd.f32 %v70_v12, %v69_v11 }
  0xc4   :  { %v72_v14 = vrot.slane %v71_v13, 1 }
  0xc6   :  { %v73_v15 = vadd.f32 %v72_v14, %v71_v13 }
  0xc8   :  { %92 = vpush %v73_v15 }
  0xf9   :  { %s93_s1 = spop %92 }
  0xfa   :  { %76 = sst [smem:[#allocation8]] %s93_s1 }
  0xfb   :  { %152 = shalt.err (!%p149_p4)
}
  0xfc   :  { %s163_s13 = smov [#allocation8]  }
  0xfd   :  { %84 = dma.smem_to_hbm %s163_s13, 16, %s217_s2, [#allocation5]  }
  0xfe   :  { %157 = dma.done.wait [#allocation5], 16  }
  0xff   :  { %158 = vsyncadd [#allocation5], 4294967280 }
 0x100   :  { %88 = sfence }
 0x101   :  { %89 = vsyncpa [#allocation4], 1 }
 0x102   :  { %90 = vsyncpa [#allocation7], 1 }
 0x103   :  { %91 = vsyncpa [#allocation5], 1 }

</bundles_post_ra>
